<compile_context>
chip_gen: v7x
topology: tpu7x:2x2x1
jax: 0.10.0
libtpu: 0.0.40
codegen_flags: <defaults>
</compile_context>

<pallas_src>
import functools
import math

import jax
import jax.numpy as jnp
import numpy as np
from jax import lax
from jax.experimental import pallas as pl
from jax.experimental.pallas import tpu as pltpu


# ----------------------------------------------------------------------------
# Trace-time hardware probing (cached).
# ----------------------------------------------------------------------------

@functools.lru_cache(maxsize=None)
def _chip_config():
    """(num TensorCores to shard over, default f32-tile bytes).

    v5e/v6e: single TensorCore per device, 128 MiB VMEM -> big tiles, no core axis.
    v4 (megacore) / v7x: 2 TensorCores -> leading "parallel" axis; v7x has only
    64 MiB VMEM so tiles stay ~4 MiB.
    """
    try:
        dev = jax.devices()[0]
        if dev.platform != "tpu":
            return 1, 4 << 20
        kind = (getattr(dev, "device_kind", "") or "").lower()
    except Exception:
        return 1, 4 << 20
    if "v7" in kind or "v4" in kind:
        return 2, 4 << 20
    return 1, 8 << 20


@functools.lru_cache(maxsize=None)
def _roll_shift_sign():
    """Probe pltpu.roll's shift convention once: +1 if out[l] == in[l - s].

    Guarded to the TPU backend; elsewhere assume the jnp.roll convention (+1).
    """
    try:
        if jax.devices()[0].platform != "tpu":
            return 1

        def k(x_ref, o_ref):
            o_ref[...] = pltpu.roll(x_ref[...], 1, 1)

        with jax.ensure_compile_time_eval():
            x = jnp.arange(8 * 128, dtype=jnp.float32).reshape(8, 128)
            rolled = np.asarray(
                pl.pallas_call(
                    k, out_shape=jax.ShapeDtypeStruct((8, 128), jnp.float32))(x))
        return 1 if rolled[0, 1] == 0.0 else -1
    except Exception:
        return 1


# ----------------------------------------------------------------------------
# Kernel factory.
# ----------------------------------------------------------------------------

def _make_kernel(*, G, LANES, tile_r, num_blocks, blocks_per_core, ncores,
                 rows_last, use_mxu, roll_sign):
    has_partial = rows_last != tile_r
    has_dup = ncores * blocks_per_core != num_blocks

    def _roll_down(v, s):
        # out[..., l] = v[..., l - s], independent of roll's sign convention.
        return pltpu.roll(v, (roll_sign * s) % LANES, 1)

    def _leader_diff_roll(x, offs):
        # Broadcast each group's leader (offset 0) to all G lanes of its group
        # with ceil(log2 G) XLU lane rolls, then subtract.  offs = lane % G.
        b = jnp.where(offs == 0, x, 0.0)
        cov = 1
        while cov * 2 <= G:
            b = b + _roll_down(b, cov)
            cov *= 2
        if cov < G:                               # non-power-of-two G fix-up
            b = jnp.where(offs < cov, b, _roll_down(b, G - cov))
        return x - b

    def kernel(aux_ref, x_ref, o_ref):
        c = pl.program_id(0)
        r = pl.program_id(1)

        @pl.when(r == 0)
        def _init():
            o_ref[...] = jnp.zeros_like(o_ref)

        x = x_ref[...]
        if not use_mxu:
            x = x.astype(jnp.float32)

        def accumulate(xt):
            if use_mxu:
                # Exact for bf16: each output element is the sum of two exact
                # (+/-1 * bf16) products accumulated in f32.
                d = jnp.dot(xt, aux_ref[...], preferred_element_type=jnp.float32)
            else:
                d = _leader_diff_roll(xt, aux_ref[...])
            # Pure-VPU partial reduction onto a lane-dense (8, LANES) slab;
            # the single cross-lane reduce happens in the wrapper.
            partial = jnp.sum((d * d).reshape(tile_r // 8, 8, LANES), axis=0)
            o_ref[...] += partial[None]

        block_id = c * blocks_per_core + r

        if has_partial:
            # Full blocks: no masking work at all.
            @pl.when(block_id < num_blocks - 1)
            def _full():
                accumulate(x)

            # Exactly one partial block: mask its tail rows with a (tile_r, 1)
            # sublane iota; the broadcast happens inside the where.
            @pl.when(block_id == num_blocks - 1)
            def _partial():
                rows = lax.broadcasted_iota(jnp.int32, (tile_r, 1), 0)
                accumulate(jnp.where(rows < rows_last, x, jnp.zeros_like(x)))
        elif has_dup:
            # Clamped duplicate blocks on the 2-core grid: skip them outright.
            @pl.when(block_id < num_blocks)
            def _in_range():
                accumulate(x)
        else:
            accumulate(x)

    return kernel


# ----------------------------------------------------------------------------
# Wrapper.
# ----------------------------------------------------------------------------

@functools.partial(jax.jit, static_argnames=("target_block_bytes",))
def attention_equalization_loss(attentions, *, target_block_bytes=None):
    """sum_{i>=1} ||attn[..., 0] - attn[..., i]||^2  (nn.MSELoss reduction='sum')."""
    *lead, G = attentions.shape
    if G <= 1:
        return jnp.zeros((), jnp.float32)

    # dtype policy: keep f32/bf16 as-is; f64 -> f32; everything else -> bf16
    # (half the HBM traffic of an f32 upcast; the math below is f32 either way).
    name = attentions.dtype.name
    if name == "float64":
        attentions = attentions.astype(jnp.float32)
    elif name not in ("float32", "bfloat16"):
        attentions = attentions.astype(jnp.bfloat16)

    itemsize = attentions.dtype.itemsize
    sub_align = 8 * (4 // itemsize)              # 8-row tiles (f32), 16 (bf16)
    E = math.prod(lead) * G                      # total element count
    LANES = 128 * G // math.gcd(128, G)          # lcm(128, G): lane-dense rows
    M = E // LANES                               # full rows consumed by the kernel

    ncores, default_blk = _chip_config()
    f32_tile_bytes = default_blk if target_block_bytes is None else target_block_bytes

    tile_r = max(sub_align, f32_tile_bytes // (LANES * 4))
    tile_r = (min(tile_r, M) // sub_align) * sub_align

    kern_loss = jnp.zeros((), jnp.float32)
    kernel_rows = 0
    if tile_r >= sub_align:                      # enough rows for >= 1 block
        kernel_rows = M
        if E % LANES == 0:
            x2d = attentions.reshape(M, LANES)   # free row-major reshape
        else:
            # Ragged prefix: no free (M, LANES) view exists, so this pays one
            # extra HBM pass.  TODO(synk): stream the ragged prefix without the
            # slice copy (needs a flat-index / non-rectangular DMA path).
            x2d = attentions.reshape(-1)[: M * LANES].reshape(M, LANES)

        num_blocks = -(-M // tile_r)
        blocks_per_core = -(-num_blocks // ncores)
        rows_last = M - (num_blocks - 1) * tile_r
        use_mxu = (name == "bfloat16" or attentions.dtype.name == "bfloat16") and LANES <= 512

        if use_mxu:
            idx = np.arange(LANES)
            W = np.zeros((LANES, LANES), np.float32)
            W[idx, idx] += 1.0
            W[(idx // G) * G, idx] -= 1.0        # leader columns end up all-zero
            aux = jnp.asarray(W, dtype=attentions.dtype)
            aux_spec = pl.BlockSpec((LANES, LANES), lambda c, r: (0, 0))
        else:
            aux = jnp.asarray((np.arange(LANES) % G).reshape(1, LANES), jnp.int32)
            aux_spec = pl.BlockSpec((1, LANES), lambda c, r: (0, 0))

        if ncores == 1:
            x_map = lambda c, r: (r, 0)
        else:
            x_map = lambda c, r: (jnp.minimum(c * blocks_per_core + r,
                                              num_blocks - 1), 0)

        kernel = _make_kernel(
            G=G, LANES=LANES, tile_r=tile_r, num_blocks=num_blocks,
            blocks_per_core=blocks_per_core, ncores=ncores, rows_last=rows_last,
            use_mxu=use_mxu, roll_sign=1 if use_mxu else _roll_shift_sign())

        # VMEM budget: double-buffered input + f32 temporaries of the compute
        # chain + the resident aux block + headroom.
        in_blk = tile_r * LANES * itemsize
        f32_blk = tile_r * LANES * 4
        vmem_limit = (2 * in_blk + 4 * f32_blk
                      + 2 * aux.size * aux.dtype.itemsize + (8 << 20))
        vmem_limit = int(min(max(vmem_limit, 16 << 20), 96 << 20))

        partials = pl.pallas_call(
            kernel,
            out_shape=jax.ShapeDtypeStruct((ncores, 8, LANES), jnp.float32),
            grid_spec=pltpu.PrefetchScalarGridSpec(
                num_scalar_prefetch=0,
                grid=(ncores, blocks_per_core),
                in_specs=[aux_spec,
                          pl.BlockSpec((tile_r, LANES), x_map)],
                out_specs=pl.BlockSpec((1, 8, LANES), lambda c, r: (c, 0, 0)),
            ),
            compiler_params=pltpu.CompilerParams(
                dimension_semantics=("parallel", "arbitrary"),
                vmem_limit_bytes=vmem_limit,
            ),
        )(aux, x2d)
        kern_loss = jnp.sum(partials, dtype=jnp.float32)

    # Elements that do not fill a full LANES-wide row (or inputs too small for a
    # single block): tiny pure-jnp epilogue over whole groups.
    n_tail = E - kernel_rows * LANES
    tail_loss = jnp.zeros((), jnp.float32)
    if n_tail > 0:
        t = attentions.reshape(-1)[E - n_tail:].reshape(-1, G).astype(jnp.float32)
        tail_loss = jnp.sum(jnp.square(t - t[:, :1]))

    return kern_loss + tail_loss


# ----------------------------------------------------------------------------
# Reference + tests.
# ----------------------------------------------------------------------------

def _reference_loss(attentions):
    """Pure-JAX reference mirroring the PyTorch loop."""
    a = attentions.astype(jnp.float32)
    G = a.shape[-1]
    total = jnp.zeros((), jnp.float32)
    for i in range(1, G):
        d = a[..., 0] - a[..., i]
        total = total + jnp.sum(d * d)
    return total


def _check(attentions, rtol=1e-5, atol=1e-5, **kw):
    out = jax.block_until_ready(attention_equalization_loss(attentions, **kw))
    ref = jax.block_until_ready(_reference_loss(attentions))
    assert jnp.allclose(out, ref, rtol=rtol, atol=atol), (out, ref)
    return out


if __name__ == "__main__":
    key = jax.random.PRNGKey(0)
    k1, k2, k3 = jax.random.split(key, 3)

    # (1) small demo shape (f32 roll path, single block): B=2, H=4, S=64, G=8
    att1 = jax.nn.softmax(jax.random.normal(k1, (2, 4, 64, 8), jnp.float32), -1)
    _check(att1)

    # (2) tiny tiles: multi-block grid with a partial last block -> exercises the
    #     mask-only-the-partial-block branch (and duplicate-skip on 2-TC chips)
    att2 = jax.nn.softmax(jax.random.normal(k2, (2, 4, 100, 8), jnp.float32), -1)
    _check(att2, target_block_bytes=16 * 128 * 4)

    # (3) non-power-of-two group count (G=6 -> 384-lane rows + roll fix-up)
    #     with a ragged element tail handled by the jnp epilogue
    att3 = jax.nn.softmax(jax.random.normal(k3, (2, 4, 81, 6), jnp.float32), -1)
    _check(att3)

    # (4) bf16 input -> exact MXU leader-difference path, single block
    _check(att1.astype(jnp.bfloat16), rtol=1e-4, atol=1e-4)

    # (5) bf16 + tiny tiles -> MXU path together with the partial-block mask branch
    _check(att2.astype(jnp.bfloat16), rtol=1e-4, atol=1e-4,
           target_block_bytes=16 * 128 * 4)

    print("KERNEL_OK")
</pallas_src>

<mosaic_0001>
module attributes {stable_mosaic.version = 11 : i64} {
  func.func @kernel(%arg0: i32, %arg1: i32, %arg2: memref<1x128xi32, #tpu.memory_space<vmem>>, %arg3: memref<32x128xf32, #tpu.memory_space<vmem>>, %arg4: memref<1x8x128xf32, #tpu.memory_space<vmem>>) attributes {dimension_semantics = [#tpu.dimension_semantics<parallel>, #tpu.dimension_semantics<arbitrary>], iteration_bounds = array<i64: 1, 1>, scalar_prefetch = 0 : i64, scratch_operands = 0 : i64, tpu.core_type = #tpu.core_type<tc>, window_params = [{pipeline_mode = #tpu.pipeline_mode<synchronous>, transform_indices = @transform_0, window_bounds = array<i64: 1, 128>}, {transform_indices = @transform_1, window_bounds = array<i64: 32, 128>}, {transform_indices = @transform_2, window_bounds = array<i64: 1, 8, 128>}]} {
    %c0_i32 = arith.constant 0 : i32
    %0 = arith.cmpi eq, %arg1, %c0_i32 : i32
    %1 = arith.extui %0 : i1 to i32
    %c0_i32_0 = arith.constant 0 : i32
    %2 = arith.cmpi ne, %1, %c0_i32_0 : i32
    scf.if %2 {
      %cst_12 = arith.constant 0.000000e+00 : f32
      %25 = vector.broadcast %cst_12 : f32 to vector<1x8x128xf32>
      %c0_13 = arith.constant 0 : index
      %c0_14 = arith.constant 0 : index
      %c0_15 = arith.constant 0 : index
      %26 = vector.load %arg4[%c0_13, %c0_14, %c0_15] : memref<1x8x128xf32, #tpu.memory_space<vmem>>, vector<1x8x128xf32>
      tpu.vector_store %arg4[%c0_13, %c0_14, %c0_15], %25 {strides = array<i32>} : memref<1x8x128xf32, #tpu.memory_space<vmem>>, vector<1x8x128xf32>,
    } else {
    }
    %c0 = arith.constant 0 : index
    %c0_1 = arith.constant 0 : index
    %3 = vector.load %arg3[%c0, %c0_1] : memref<32x128xf32, #tpu.memory_space<vmem>>, vector<32x128xf32>
    %c0_2 = arith.constant 0 : index
    %c0_3 = arith.constant 0 : index
    %4 = vector.load %arg2[%c0_2, %c0_3] : memref<1x128xi32, #tpu.memory_space<vmem>>, vector<1x128xi32>
    %c0_i32_4 = arith.constant 0 : i32
    %5 = vector.broadcast %c0_i32_4 : i32 to vector<1x128xi32>
    %6 = arith.cmpi eq, %4, %5 : vector<1x128xi32>
    %cst = arith.constant 0.000000e+00 : f32
    %7 = vector.shape_cast %6 : vector<1x128xi1> to vector<1x128xi1>
    %8 = vector.broadcast %7 : vector<1x128xi1> to vector<32x128xi1>
    %9 = vector.broadcast %cst : f32 to vector<32x128xf32>
    %10 = arith.select %8, %3, %9 : vector<32x128xi1>, vector<32x128xf32>
    %c1_i32 = arith.constant 1 : i32
    %11 = tpu.dynamic_rotate %10 by %c1_i32 dim 1 : vector<32x128xf32>, i32 -> vector<32x128xf32>
    %12 = arith.addf %10, %11 : vector<32x128xf32>
    %c2_i32 = arith.constant 2 : i32
    %13 = tpu.dynamic_rotate %12 by %c2_i32 dim 1 : vector<32x128xf32>, i32 -> vector<32x128xf32>
    %14 = arith.addf %12, %13 : vector<32x128xf32>
    %c4_i32 = arith.constant 4 : i32
    %15 = tpu.dynamic_rotate %14 by %c4_i32 dim 1 : vector<32x128xf32>, i32 -> vector<32x128xf32>
    %16 = arith.addf %14, %15 : vector<32x128xf32>
    %17 = arith.subf %3, %16 : vector<32x128xf32>
    %18 = arith.mulf %17, %17 : vector<32x128xf32>
    %19 = vector.shape_cast %18 : vector<32x128xf32> to vector<4x8x128xf32>
    %cst_5 = arith.constant dense<0.000000e+00> : vector<8x128xf32>
    %20 = vector.multi_reduction <add>, %19, %cst_5 [0] : vector<4x8x128xf32> to vector<8x128xf32>
    %c0_6 = arith.constant 0 : index
    %c0_7 = arith.constant 0 : index
    %c0_8 = arith.constant 0 : index
    %21 = vector.load %arg4[%c0_6, %c0_7, %c0_8] : memref<1x8x128xf32, #tpu.memory_space<vmem>>, vector<1x8x128xf32>
    %22 = vector.shape_cast %20 : vector<8x128xf32> to vector<1x8x128xf32>
    %23 = arith.addf %21, %22 : vector<1x8x128xf32>
    %c0_9 = arith.constant 0 : index
    %c0_10 = arith.constant 0 : index
    %c0_11 = arith.constant 0 : index
    %24 = vector.load %arg4[%c0_9, %c0_10, %c0_11] : memref<1x8x128xf32, #tpu.memory_space<vmem>>, vector<1x8x128xf32>
    tpu.vector_store %arg4[%c0_9, %c0_10, %c0_11], %23 {strides = array<i32>} : memref<1x8x128xf32, #tpu.memory_space<vmem>>, vector<1x8x128xf32>,
    return
  }
  func.func @transform_0(%arg0: i32, %arg1: i32) -> (i32, i32) {
    %c0_i32 = arith.constant 0 : i32
    %c0_i32_0 = arith.constant 0 : i32
    %c0_i32_1 = arith.constant 0 : i32
    return %c0_i32, %c0_i32_0 : i32, i32
  }
  func.func @transform_1(%arg0: i32, %arg1: i32) -> (i32, i32) {
    %c0_i32 = arith.constant 0 : i32
    %c0_i32_0 = arith.constant 0 : i32
    return %arg1, %c0_i32 : i32, i32
  }
  func.func @transform_2(%arg0: i32, %arg1: i32) -> (i32, i32, i32) {
    %c0_i32 = arith.constant 0 : i32
    %c0_i32_0 = arith.constant 0 : i32
    %c0_i32_1 = arith.constant 0 : i32
    return %arg0, %c0_i32, %c0_i32_0 : i32, i32, i32
  }
}

</mosaic_0001>

<bundles_post_ra>
// kernel: attention_equalization_loss.1
= control target key start
LH: loop header
LB: loop body
LE: loop exit
PB: predicated region body
PF: predicated region fallthrough
CT: control target
= control target key end

     0   :  { %v23_v0 = vlaneseq  ;;  %v91_v3 = vmov 0   ;;  %s92_s18 = smov 1   ;;  %s93_s19 = smov 2   ;;  %s128_s0 = inlined_call_operand.vmem [shape: s32[1,128], index: 0, kind: input, shape index: {}]   ;;  %s129_s1 = inlined_call_operand.vmem [shape: f32[32,128], index: 1, kind: input, shape index: {}]   ;;  %s130_s2 = inlined_call_operand.vmem [shape: f32[1,8,128], index: 2, kind: output, shape index: {}]  }
   0x1   :  { %v20_v1 = vld [vmem:[%s128_s0] sm:$0x1]  ;;  %v18_v8 = vld [vmem:[%s129_s1 + $0x10] sm:$0xff]  ;;  %v17_v9 = vld [vmem:[%s129_s1 + $0x8] sm:$0xff] }
   0x2   :  { %vm21_vm0 = vcmp.eq.s32.totalorder %v20_v1, 0  ;;  %v24_v2 = vshrl.u32 %v23_v0, 7  ;;  %v16_v6 = vld [vmem:[%s129_s1] sm:$0xff]  ;;  %v19_v10 = vld [vmem:[%s129_s1 + $0x18] sm:$0xff]  ;;  %s94_s1 = smov 4  }
   0x3   :  { %v22_v4 = vsel %vm21_vm0, 1, %v91_v3 }
   0x4   :  { %v25_v5 = vsub.s32 0, %v24_v2 }
   0x6   :  { %v26_v7 = vrot.slane %v22_v4, %v25_v5 }
   0x8   :  { %vm27_vm1 = vcmp.eq.s32.totalorder %v26_v7, 1 }
   0x9   :  { %v28_v11 = vsel %vm27_vm1, %v16_v6, 0.0  ;;  %v30_v12 = vsel %vm27_vm1, %v18_v8, 0.0  ;;  %v29_v13 = vsel %vm27_vm1, %v17_v9, 0.0  ;;  %v31_v14 = vsel %vm27_vm1, %v19_v10, 0.0 }
   0xa   :  { %32 = vrot.lane.b32.xlu0 %v28_v11, %s92_s18  ;;  %36 = vrot.lane.b32.xlu1 %v30_v12, %s92_s18 }
   0xe   :  { %34 = vrot.lane.b32.xlu0 %v29_v13, %s92_s18  ;;  %38 = vrot.lane.b32.xlu1 %v31_v14, %s92_s18 }
  0x7c   :  { %v33_v15 = vpop.permute.xlu0 %32  ;;  %v37_v16 = vpop.permute.xlu1 %36 }
  0x7d   :  { %v40_v17 = vadd.f32 %v33_v15, %v28_v11  ;;  %v42_v18 = vadd.f32 %v37_v16, %v30_v12 }
  0x7f   :  { %44 = vrot.lane.b32.xlu0 %v40_v17, %s93_s19 }
  0x80   :  { %v35_v19 = vpop.permute.xlu0 %34  ;;  %v39_v20 = vpop.permute.xlu1 %38 }
  0x81   :  { %v41_v21 = vadd.f32 %v35_v19, %v29_v13  ;;  %v43_v22 = vadd.f32 %v39_v20, %v31_v14 }
  0x83   :  { %48 = vrot.lane.b32.xlu0 %v42_v18, %s93_s19  ;;  %46 = vrot.lane.b32.xlu1 %v41_v21, %s93_s19 }
  0x87   :  { %50 = vrot.lane.b32.xlu1 %v43_v22, %s93_s19 }
  0xf1   :  { %v45_v23 = vpop.permute.xlu0 %44 }
  0xf2   :  { %v52_v24 = vadd.f32 %v45_v23, %v40_v17 }
  0xf4   :  { %56 = vrot.lane.b32.xlu0 %v52_v24, %s94_s1 }
  0xf5   :  { %v47_v25 = vpop.permute.xlu1 %46  ;;  %v49_v26 = vpop.permute.xlu0 %48 }
  0xf6   :  { %v53_v27 = vadd.f32 %v47_v25, %v41_v21  ;;  %v54_v28 = vadd.f32 %v49_v26, %v42_v18 }
  0xf8   :  { %58 = vrot.lane.b32.xlu1 %v53_v27, %s94_s1  ;;  %60 = vrot.lane.b32.xlu0 %v54_v28, %s94_s1 }
  0xf9   :  { %v51_v29 = vpop.permute.xlu1 %50 }
  0xfa   :  { %v55_v30 = vadd.f32 %v51_v29, %v43_v22 }
  0xfc   :  { %62 = vrot.lane.b32.xlu1 %v55_v30, %s94_s1 }
 0x166   :  { %v57_v31 = vpop.permute.xlu0 %56 }
 0x167   :  { %v64_v32 = vadd.f32 %v57_v31, %v52_v24 }
 0x169   :  { %v68_v35 = vsub.f32 %v16_v6, %v64_v32 }
 0x16a   :  { %v59_v33 = vpop.permute.xlu1 %58  ;;  %v61_v34 = vpop.permute.xlu0 %60 }
 0x16b   :  { %v65_v36 = vadd.f32 %v59_v33, %v53_v27  ;;  %v66_v37 = vadd.f32 %v61_v34, %v54_v28  ;;  %v72_v41 = vmul.f32 %v68_v35, %v68_v35 }
 0x16d   :  { %v69_v38 = vsub.f32 %v17_v9, %v65_v36  ;;  %v70_v39 = vsub.f32 %v18_v8, %v66_v37 }
 0x16e   :  { %v63_v40 = vpop.permute.xlu1 %62 }
 0x16f   :  { %v73_v42 = vmul.f32 %v69_v38, %v69_v38  ;;  %v67_v43 = vadd.f32 %v63_v40, %v55_v30  ;;  %v74_v45 = vmul.f32 %v70_v39, %v70_v39 }
 0x171   :  { %v76_v44 = vadd.f32 %v73_v42, %v72_v41  ;;  %v71_v46 = vsub.f32 %v19_v10, %v67_v43 }
 0x173   :  { %v77_v47 = vadd.f32 %v76_v44, %v74_v45  ;;  %v75_v48 = vmul.f32 %v71_v46, %v71_v46 }
 0x175   :  { %v78_v49 = vadd.f32 %v77_v47, %v75_v48 }
 0x177   :  { %81 = vst [vmem:[%s130_s2] sm:$0xff] %v78_v49 }

</bundles_post_ra>
